<compile_context>
chip_gen: v5e
topology: v5e:2x2
jax: 0.10.0
libtpu: 0.0.40
codegen_flags: <defaults>
</compile_context>

<pallas_src>
import functools

import jax
import jax.numpy as jnp
from jax.experimental import pallas as pl
from jax.experimental.pallas import tpu as pltpu


_LANE = 128      # vreg lane width (last dim granularity)
_SUBLANE = 8     # vreg sublane count (second-to-last dim granularity, f32)


def _round_up(x: int, m: int) -> int:
    return ((x + m - 1) // m) * m


def _vmem_capacity_bytes() -> int:
    """Per-core VMEM capacity; conservative 64 MiB (v7x) fallback."""
    try:
        return int(pltpu.get_tpu_info().vmem_capacity_bytes)
    except Exception:
        return 64 * 1024 * 1024


def _resident_spec(shape, single_buffer: bool):
    """BlockSpec for an operand whose block never changes across the grid.

    Single-buffered when the API allows it: the default double-buffering would
    allocate the weight twice in VMEM for zero benefit.
    """
    index_map = lambda i, _n=len(shape): (0,) * _n
    if single_buffer and hasattr(pl, "Buffered"):
        try:
            return pl.BlockSpec(shape, index_map, pipeline_mode=pl.Buffered(1))
        except TypeError:
            pass
    return pl.BlockSpec(shape, index_map)


def _choose_tile_b(B, in_p, hid_p, out_p, w_bytes, vmem_capacity):
    """Pick the batch tile (rows) from a VMEM budget + per-step-overhead model."""
    weights_bytes = w_bytes * (in_p * hid_p + hid_p * out_p) + 4 * (hid_p + out_p)
    # double-buffered x/y tiles + f32 hidden intermediate, per batch row
    per_row = 4 * (2 * in_p + 2 * out_p + hid_p)
    budget = int(0.8 * vmem_capacity) - weights_bytes
    if budget < per_row * _SUBLANE:
        max_rows = _SUBLANE
    else:
        max_rows = min(1024, (budget // per_row) // _SUBLANE * _SUBLANE)

    step_ns = 350.0                          # ~0.35 us per grid step
    row_ns = 4.0 * (in_p + out_p) / 1000.0   # streamed HBM bytes per row @ ~1 TB/s

    best_tb, best_cost = _SUBLANE, None
    for cand in (1024, 512, 256, 128, 64, 32, 16, 8):
        if cand > max_rows:
            continue
        b_pad = _round_up(max(B, 1), cand)
        cost = b_pad * row_ns + (b_pad // cand) * step_ns
        if best_cost is None or cost < best_cost:
            best_tb, best_cost = cand, cost

    b_pad = _round_up(max(B, 1), best_tb)
    # v7x megacore: if everything landed in a single grid step, split it in two
    # when that adds no padded rows (costs one extra ~0.35 us step on 1-TC chips).
    if b_pad // best_tb == 1 and best_tb > _SUBLANE:
        half = max(_SUBLANE, best_tb // 2)
        if _round_up(max(B, 1), half) == b_pad:
            best_tb = half
    return best_tb, _round_up(max(B, 1), best_tb)


def _encoder_kernel(x_ref, w1_ref, b1_ref, w2_ref, b2_ref, o_ref):
    # hidden = relu(x @ W1 + b1)
    h = jnp.dot(x_ref[...].astype(w1_ref.dtype), w1_ref[...],
                preferred_element_type=jnp.float32)
    h = jnp.maximum(h + b1_ref[...], 0.0)              # (TB, H) + (1, H) broadcast
    # out = tanh(h @ W2 + b2)   -- tanh on EUP (its own VLIW slot, ~free here)
    y = jnp.dot(h.astype(w2_ref.dtype), w2_ref[...],
                preferred_element_type=jnp.float32)
    o_ref[...] = jnp.tanh(y + b2_ref[...])             # (TB, O) + (1, O) broadcast


def prepare_encoder_params(w1, b1, w2, b2, weight_dtype=jnp.float32):
    """One-time padding of weights/biases to lane-dense (multiple-of-128) shapes.

    w1: (in_feat, hidden)  b1: (hidden,) or (1, hidden)
    w2: (hidden, out)      b2: (out,)    or (1, out)
    `weight_dtype=jnp.bfloat16` trades a little precision for ~3-4x MXU
    throughput and half the weight footprint (default keeps fp32 exactness).
    """
    in_dim, hid_dim = w1.shape
    out_dim = w2.shape[1]
    in_p = _round_up(in_dim, _LANE)
    hid_p = _round_up(hid_dim, _LANE)
    out_p = _round_up(out_dim, _LANE)

    b1 = jnp.reshape(b1, (1, hid_dim))
    b2 = jnp.reshape(b2, (1, out_dim))
    # Zero padding is semantics preserving: zero input cols x zero W1 rows add
    # nothing; padded hidden cols give relu(0+0)=0 -> zero W2 rows add nothing;
    # padded output cols are sliced off in the wrapper.
    w1p = jnp.pad(w1, ((0, in_p - in_dim), (0, hid_p - hid_dim))).astype(weight_dtype)
    b1p = jnp.pad(b1, ((0, 0), (0, hid_p - hid_dim))).astype(jnp.float32)
    w2p = jnp.pad(w2, ((0, hid_p - hid_dim), (0, out_p - out_dim))).astype(weight_dtype)
    b2p = jnp.pad(b2, ((0, 0), (0, out_p - out_dim))).astype(jnp.float32)
    return dict(w1=w1p, b1=b1p, w2=w2p, b2=b2p,
                in_dim=in_dim, hid_dim=hid_dim, out_dim=out_dim)


def encoder_forward(x, params):
    """x: (B, input_dim*frames_count) float32; params from prepare_encoder_params.
    Returns (B, output_dim) float32."""
    w1, b1, w2, b2 = params["w1"], params["b1"], params["w2"], params["b2"]
    in_dim, out_dim = params["in_dim"], params["out_dim"]
    B = x.shape[0]
    in_p, hid_p = w1.shape
    out_p = w2.shape[1]
    w_bytes = jnp.dtype(w1.dtype).itemsize

    cap = _vmem_capacity_bytes()
    tb, b_p = _choose_tile_b(B, in_p, hid_p, out_p, w_bytes, cap)

    # Pad x only when actually needed (no-op copy is skipped for aligned shapes).
    xp = x.astype(jnp.float32)
    if b_p != B or in_p != in_dim:
        xp = jnp.pad(xp, ((0, b_p - B), (0, in_p - in_dim)))

    # VMEM footprint: resident weights (single-buffered) + double-buffered x/y
    # tiles + hidden intermediate. Size the scoped limit with headroom, capped
    # below physical capacity (binding on v7x 64 MiB / v5e 16 MiB default).
    needed = (w_bytes * (in_p * hid_p + hid_p * out_p) + 4 * (hid_p + out_p)
              + 4 * tb * (2 * in_p + 2 * out_p + hid_p))
    vmem_limit = int(min(0.9 * cap, max(2 * needed, 32 << 20)))

    cost = pl.CostEstimate(
        flops=2 * b_p * (in_p * hid_p + hid_p * out_p),
        transcendentals=b_p * out_p,
        bytes_accessed=(4 * b_p * (in_p + out_p)
                        + w_bytes * (in_p * hid_p + hid_p * out_p)
                        + 4 * (hid_p + out_p)),
    )

    def _run(single_buffer_weights: bool):
        return pl.pallas_call(
            _encoder_kernel,
            out_shape=jax.ShapeDtypeStruct((b_p, out_p), jnp.float32),
            grid=(b_p // tb,),
            in_specs=[
                pl.BlockSpec((tb, in_p), lambda i: (i, 0)),           # x: batch-tiled
                _resident_spec((in_p, hid_p), single_buffer_weights),  # W1 resident
                _resident_spec((1, hid_p), single_buffer_weights),     # b1 resident
                _resident_spec((hid_p, out_p), single_buffer_weights), # W2 resident
                _resident_spec((1, out_p), single_buffer_weights),     # b2 resident
            ],
            out_specs=pl.BlockSpec((tb, out_p), lambda i: (i, 0)),
            compiler_params=pltpu.CompilerParams(
                dimension_semantics=("parallel",),
                vmem_limit_bytes=vmem_limit),
            cost_estimate=cost,
        )(xp, w1, b1, w2, b2)

    try:
        out = _run(single_buffer_weights=True)
    except Exception:
        # Fallback for jax versions where Buffered(1) is rejected at lowering.
        out = _run(single_buffer_weights=False)

    if b_p != B or out_p != out_dim:
        out = out[:B, :out_dim]
    return out


def make_params(key, input_dim, frames_count, output_dim, hidden_dim):
    """Synthetic init mirroring nn.Linear shapes (weights stored transposed).

    PyTorch:  hidden = Linear(input_dim * frames_count, hidden_dim)
              out    = Linear(hidden_dim, output_dim)
    """
    k1, k2, k3, k4 = jax.random.split(key, 4)
    in_feat = input_dim * frames_count
    s1 = 1.0 / jnp.sqrt(in_feat)
    s2 = 1.0 / jnp.sqrt(hidden_dim)
    w1 = jax.random.uniform(k1, (in_feat, hidden_dim), jnp.float32, -s1, s1)
    b1 = jax.random.uniform(k2, (1, hidden_dim), jnp.float32, -s1, s1)
    w2 = jax.random.uniform(k3, (hidden_dim, output_dim), jnp.float32, -s2, s2)
    b2 = jax.random.uniform(k4, (1, output_dim), jnp.float32, -s2, s2)
    return w1, b1, w2, b2


if __name__ == "__main__":
    # Small shapes consistent with Encoder's forward signature.
    input_dim = 16
    frames_count = 8          # in_features = 128 (already lane-aligned)
    hidden_dim = 64           # padded to 128 once, at param-prep time
    output_dim = 32           # padded to 128 once; sliced back after the call
    batch = 8

    key = jax.random.PRNGKey(0)
    kx, kp = jax.random.split(key)
    x = jax.random.normal(kx, (batch, input_dim * frames_count), jnp.float32)
    w1, b1, w2, b2 = make_params(kp, input_dim, frames_count, output_dim, hidden_dim)

    params = prepare_encoder_params(w1, b1, w2, b2)   # one-time padding
    y = jax.block_until_ready(encoder_forward(x, params))

    # Pure-JAX reference of the same forward pass.
    h_ref = jnp.maximum(x @ w1 + b1, 0.0)
    y_ref = jnp.tanh(h_ref @ w2 + b2)
    assert y.shape == (batch, output_dim)
    assert jnp.allclose(y, y_ref, atol=1e-5, rtol=1e-5)

    print("KERNEL_OK")
</pallas_src>

<mosaic_0001>
module attributes {stable_mosaic.version = 11 : i64} {
  func.func @_encoder_kernel(%arg0: i32, %arg1: memref<8x128xf32, #tpu.memory_space<vmem>>, %arg2: memref<128x128xf32, #tpu.memory_space<vmem>>, %arg3: memref<1x128xf32, #tpu.memory_space<vmem>>, %arg4: memref<128x128xf32, #tpu.memory_space<vmem>>, %arg5: memref<1x128xf32, #tpu.memory_space<vmem>>, %arg6: memref<8x128xf32, #tpu.memory_space<vmem>>) attributes {dimension_semantics = [#tpu.dimension_semantics<parallel>], iteration_bounds = array<i64: 1>, scalar_prefetch = 0 : i64, scratch_operands = 0 : i64, tpu.core_type = #tpu.core_type<tc>, window_params = [{transform_indices = @transform_0, window_bounds = array<i64: 8, 128>}, {pipeline_mode = #tpu.pipeline_mode<synchronous>, transform_indices = @transform_1, window_bounds = array<i64: 128, 128>}, {pipeline_mode = #tpu.pipeline_mode<synchronous>, transform_indices = @transform_2, window_bounds = array<i64: 1, 128>}, {pipeline_mode = #tpu.pipeline_mode<synchronous>, transform_indices = @transform_3, window_bounds = array<i64: 128, 128>}, {pipeline_mode = #tpu.pipeline_mode<synchronous>, transform_indices = @transform_4, window_bounds = array<i64: 1, 128>}, {transform_indices = @transform_5, window_bounds = array<i64: 8, 128>}]} {
    %c0 = arith.constant 0 : index
    %c0_0 = arith.constant 0 : index
    %0 = vector.load %arg1[%c0, %c0_0] : memref<8x128xf32, #tpu.memory_space<vmem>>, vector<8x128xf32>
    %c0_1 = arith.constant 0 : index
    %c0_2 = arith.constant 0 : index
    %1 = vector.load %arg2[%c0_1, %c0_2] : memref<128x128xf32, #tpu.memory_space<vmem>>, vector<128x128xf32>
    %cst = arith.constant dense<0.000000e+00> : vector<8x128xf32>
    %2 = tpu.matmul %0, %1, %cst {dimension_numbers = #tpu.dot_dimension_numbers<[1], [0], [0], [1], [0, 0, 1, 1], [], []>} : vector<8x128xf32>, vector<128x128xf32>, vector<8x128xf32> -> vector<8x128xf32>
    %c0_3 = arith.constant 0 : index
    %c0_4 = arith.constant 0 : index
    %3 = vector.load %arg3[%c0_3, %c0_4] : memref<1x128xf32, #tpu.memory_space<vmem>>, vector<1x128xf32>
    %4 = vector.broadcast %3 : vector<1x128xf32> to vector<8x128xf32>
    %5 = arith.addf %2, %4 : vector<8x128xf32>
    %cst_5 = arith.constant 0.000000e+00 : f32
    %6 = vector.broadcast %cst_5 : f32 to vector<8x128xf32>
    %7 = arith.maximumf %5, %6 : vector<8x128xf32>
    %c0_6 = arith.constant 0 : index
    %c0_7 = arith.constant 0 : index
    %8 = vector.load %arg4[%c0_6, %c0_7] : memref<128x128xf32, #tpu.memory_space<vmem>>, vector<128x128xf32>
    %cst_8 = arith.constant dense<0.000000e+00> : vector<8x128xf32>
    %9 = tpu.matmul %7, %8, %cst_8 {dimension_numbers = #tpu.dot_dimension_numbers<[1], [0], [0], [1], [0, 0, 1, 1], [], []>} : vector<8x128xf32>, vector<128x128xf32>, vector<8x128xf32> -> vector<8x128xf32>
    %c0_9 = arith.constant 0 : index
    %c0_10 = arith.constant 0 : index
    %10 = vector.load %arg5[%c0_9, %c0_10] : memref<1x128xf32, #tpu.memory_space<vmem>>, vector<1x128xf32>
    %11 = vector.broadcast %10 : vector<1x128xf32> to vector<8x128xf32>
    %12 = arith.addf %9, %11 : vector<8x128xf32>
    %13 = math.tanh %12 : vector<8x128xf32>
    %c0_11 = arith.constant 0 : index
    %c0_12 = arith.constant 0 : index
    %14 = vector.load %arg6[%c0_11, %c0_12] : memref<8x128xf32, #tpu.memory_space<vmem>>, vector<8x128xf32>
    tpu.vector_store %arg6[%c0_11, %c0_12], %13 {strides = array<i32>} : memref<8x128xf32, #tpu.memory_space<vmem>>, vector<8x128xf32>,
    return
  }
  func.func @transform_0(%arg0: i32) -> (i32, i32) {
    %c0_i32 = arith.constant 0 : i32
    %c0_i32_0 = arith.constant 0 : i32
    return %arg0, %c0_i32 : i32, i32
  }
  func.func @transform_1(%arg0: i32) -> (i32, i32) {
    %c0_i32 = arith.constant 0 : i32
    %c0_i32_0 = arith.constant 0 : i32
    %c0_i32_1 = arith.constant 0 : i32
    return %c0_i32, %c0_i32_0 : i32, i32
  }
  func.func @transform_2(%arg0: i32) -> (i32, i32) {
    %c0_i32 = arith.constant 0 : i32
    %c0_i32_0 = arith.constant 0 : i32
    %c0_i32_1 = arith.constant 0 : i32
    return %c0_i32, %c0_i32_0 : i32, i32
  }
  func.func @transform_3(%arg0: i32) -> (i32, i32) {
    %c0_i32 = arith.constant 0 : i32
    %c0_i32_0 = arith.constant 0 : i32
    %c0_i32_1 = arith.constant 0 : i32
    return %c0_i32, %c0_i32_0 : i32, i32
  }
  func.func @transform_4(%arg0: i32) -> (i32, i32) {
    %c0_i32 = arith.constant 0 : i32
    %c0_i32_0 = arith.constant 0 : i32
    %c0_i32_1 = arith.constant 0 : i32
    return %c0_i32, %c0_i32_0 : i32, i32
  }
  func.func @transform_5(%arg0: i32) -> (i32, i32) {
    %c0_i32 = arith.constant 0 : i32
    %c0_i32_0 = arith.constant 0 : i32
    return %arg0, %c0_i32 : i32, i32
  }
}

module attributes {stable_mosaic.version = 11 : i64} {
  func.func @_encoder_kernel(%arg0: i32, %arg1: memref<8x128xf32, #tpu.memory_space<vmem>>, %arg2: memref<128x128xf32, #tpu.memory_space<vmem>>, %arg3: memref<1x128xf32, #tpu.memory_space<vmem>>, %arg4: memref<128x128xf32, #tpu.memory_space<vmem>>, %arg5: memref<1x128xf32, #tpu.memory_space<vmem>>, %arg6: memref<8x128xf32, #tpu.memory_space<vmem>>) attributes {dimension_semantics = [#tpu.dimension_semantics<parallel>], iteration_bounds = array<i64: 1>, scalar_prefetch = 0 : i64, scratch_operands = 0 : i64, tpu.core_type = #tpu.core_type<tc>, window_params = [{transform_indices = @transform_0, window_bounds = array<i64: 8, 128>}, {pipeline_mode = #tpu.pipeline_mode<synchronous>, transform_indices = @transform_1, window_bounds = array<i64: 128, 128>}, {pipeline_mode = #tpu.pipeline_mode<synchronous>, transform_indices = @transform_2, window_bounds = array<i64: 1, 128>}, {pipeline_mode = #tpu.pipeline_mode<synchronous>, transform_indices = @transform_3, window_bounds = array<i64: 128, 128>}, {pipeline_mode = #tpu.pipeline_mode<synchronous>, transform_indices = @transform_4, window_bounds = array<i64: 1, 128>}, {transform_indices = @transform_5, window_bounds = array<i64: 8, 128>}]} {
    %c0 = arith.constant 0 : index
    %c0_0 = arith.constant 0 : index
    %0 = vector.load %arg1[%c0, %c0_0] : memref<8x128xf32, #tpu.memory_space<vmem>>, vector<8x128xf32>
    %c0_1 = arith.constant 0 : index
    %c0_2 = arith.constant 0 : index
    %1 = vector.load %arg2[%c0_1, %c0_2] : memref<128x128xf32, #tpu.memory_space<vmem>>, vector<128x128xf32>
    %cst = arith.constant dense<0.000000e+00> : vector<8x128xf32>
    %2 = tpu.matmul %0, %1, %cst {dimension_numbers = #tpu.dot_dimension_numbers<[1], [0], [0], [1], [0, 0, 1, 1], [], []>} : vector<8x128xf32>, vector<128x128xf32>, vector<8x128xf32> -> vector<8x128xf32>
    %c0_3 = arith.constant 0 : index
    %c0_4 = arith.constant 0 : index
    %3 = vector.load %arg3[%c0_3, %c0_4] : memref<1x128xf32, #tpu.memory_space<vmem>>, vector<1x128xf32>
    %4 = vector.broadcast %3 : vector<1x128xf32> to vector<8x128xf32>
    %5 = arith.addf %2, %4 : vector<8x128xf32>
    %cst_5 = arith.constant 0.000000e+00 : f32
    %6 = vector.broadcast %cst_5 : f32 to vector<8x128xf32>
    %7 = arith.maximumf %5, %6 : vector<8x128xf32>
    %c0_6 = arith.constant 0 : index
    %c0_7 = arith.constant 0 : index
    %8 = vector.load %arg4[%c0_6, %c0_7] : memref<128x128xf32, #tpu.memory_space<vmem>>, vector<128x128xf32>
    %cst_8 = arith.constant dense<0.000000e+00> : vector<8x128xf32>
    %9 = tpu.matmul %7, %8, %cst_8 {dimension_numbers = #tpu.dot_dimension_numbers<[1], [0], [0], [1], [0, 0, 1, 1], [], []>} : vector<8x128xf32>, vector<128x128xf32>, vector<8x128xf32> -> vector<8x128xf32>
    %c0_9 = arith.constant 0 : index
    %c0_10 = arith.constant 0 : index
    %10 = vector.load %arg5[%c0_9, %c0_10] : memref<1x128xf32, #tpu.memory_space<vmem>>, vector<1x128xf32>
    %11 = vector.broadcast %10 : vector<1x128xf32> to vector<8x128xf32>
    %12 = arith.addf %9, %11 : vector<8x128xf32>
    %13 = math.tanh %12 : vector<8x128xf32>
    %c0_11 = arith.constant 0 : index
    %c0_12 = arith.constant 0 : index
    %14 = vector.load %arg6[%c0_11, %c0_12] : memref<8x128xf32, #tpu.memory_space<vmem>>, vector<8x128xf32>
    tpu.vector_store %arg6[%c0_11, %c0_12], %13 {strides = array<i32>} : memref<8x128xf32, #tpu.memory_space<vmem>>, vector<8x128xf32>,
    return
  }
  func.func @transform_0(%arg0: i32) -> (i32, i32) {
    %c0_i32 = arith.constant 0 : i32
    %c0_i32_0 = arith.constant 0 : i32
    return %arg0, %c0_i32 : i32, i32
  }
  func.func @transform_1(%arg0: i32) -> (i32, i32) {
    %c0_i32 = arith.constant 0 : i32
    %c0_i32_0 = arith.constant 0 : i32
    %c0_i32_1 = arith.constant 0 : i32
    return %c0_i32, %c0_i32_0 : i32, i32
  }
  func.func @transform_2(%arg0: i32) -> (i32, i32) {
    %c0_i32 = arith.constant 0 : i32
    %c0_i32_0 = arith.constant 0 : i32
    %c0_i32_1 = arith.constant 0 : i32
    return %c0_i32, %c0_i32_0 : i32, i32
  }
  func.func @transform_3(%arg0: i32) -> (i32, i32) {
    %c0_i32 = arith.constant 0 : i32
    %c0_i32_0 = arith.constant 0 : i32
    %c0_i32_1 = arith.constant 0 : i32
    return %c0_i32, %c0_i32_0 : i32, i32
  }
  func.func @transform_4(%arg0: i32) -> (i32, i32) {
    %c0_i32 = arith.constant 0 : i32
    %c0_i32_0 = arith.constant 0 : i32
    %c0_i32_1 = arith.constant 0 : i32
    return %c0_i32, %c0_i32_0 : i32, i32
  }
  func.func @transform_5(%arg0: i32) -> (i32, i32) {
    %c0_i32 = arith.constant 0 : i32
    %c0_i32_0 = arith.constant 0 : i32
    return %arg0, %c0_i32 : i32, i32
  }
}

</mosaic_0001>

<bundles_post_ra>
// kernel: tpu_custom_call.1
= control target key start
LH: loop header
LB: loop body
LE: loop exit
PB: predicated region body
PF: predicated region fallthrough
CT: control target
= control target key end

     0   :  { %10 = vsyncpa [#allocation3], 0  ;;  %s334_s0 = inlined_call_operand.hbm [shape: f32[8,128], index: 0, kind: input, shape index: {}]   ;;  %s335_s1 = inlined_call_operand.hbm [shape: f32[128,128], index: 1, kind: input, shape index: {}]   ;;  %s336_s2 = inlined_call_operand.vmem [shape: f32[1,128], index: 2, kind: input, shape index: {}]   ;;  %s337_s3 = inlined_call_operand.hbm [shape: f32[128,128], index: 3, kind: input, shape index: {}]   ;;  %s338_s4 = inlined_call_operand.vmem [shape: f32[1,128], index: 4, kind: input, shape index: {}]   ;;  %s339_s5 = inlined_call_operand.hbm [shape: f32[8,128], index: 5, kind: output, shape index: {}]  }
   0x1   :  { %11 = vsyncpa [#allocation6], 0  ;;  %s28_s20 = sshll.u32 %s335_s1, 4  ;;  %s29_s20 = int_to_ptr.hbm [resolvable:$true] %s28_s20 }
   0x2   :  { %12 = vsyncpa [#allocation4], 0  ;;  %s280_s21 = smov [#allocation5]   ;;  %s18_s25 = sshll.u32 %s334_s0, 4  ;;  %s19_s25 = int_to_ptr.hbm [resolvable:$true] %s18_s25 }
   0x3   :  { %s30_s22 = sshll.u32 %s280_s21, 4  ;;  %s281_s26 = smov 128   ;;  %s31_s22 = int_to_ptr.vmem [resolvable:$true] %s30_s22 }
   0x4   :  { %s282_s27 = smov 8   ;;  %s283_s28 = smov [#allocation2]  }
   0x5   :  { %36 = dma.hbm_to_vmem [thread:$0]  %s29_s20, 2048, %s31_s22, [#allocation6], %s281_s26, %s281_s26, %s282_s27  }
   0x6   :  { %s20_s29 = sshll.u32 %s283_s28, 4  ;;  %s43_s7 = sshll.u32 %s337_s3, 4  ;;  %s21_s29 = int_to_ptr.vmem [resolvable:$true] %s20_s29  ;;  %s44_s7 = int_to_ptr.hbm [resolvable:$true] %s43_s7 }
   0x7   :  { %23 = dma.hbm_to_vmem [thread:$0]  %s19_s25, 128, %s21_s29, [#allocation3]  }
   0x8   :  { %s284_s1 = smov [#allocation7]  }
   0x9   :  { %s45_s8 = sshll.u32 %s284_s1, 4  ;;  %s46_s8 = int_to_ptr.vmem [resolvable:$true] %s45_s8 }
   0xa   :  { %51 = dma.hbm_to_vmem [thread:$0]  %s44_s7, 2048, %s46_s8, [#allocation6], %s281_s26, %s281_s26, %s282_s27  }
   0xb   :  { %274 = dma.done.wait [#allocation3], 128  }
   0xc   :  { %275 = vsyncadd [#allocation3], 4294967168 }
   0xd   :  { %276 = dma.done.wait [#allocation6], 4096  }
   0xe   :  { %277 = vsyncadd [#allocation6], 4294963200  ;;  %v82_v0 = vld [vmem:[#allocation5 + $0x78] sm:$0xff]  ;;  %v81_v1 = vld [vmem:[#allocation5 + $0x70] sm:$0xff]  ;;  %s285_s11 = smov [#allocation8]   ;;  %s157_s15 = sshll.u32 %s339_s5, 4  ;;  %s158_s15 = int_to_ptr.hbm [resolvable:$true] %s157_s15 }
   0xf   :  { %87 = vmatpush.msra.mxu0 %v82_v0  ;;  %v80_v2 = vld [vmem:[#allocation5 + $0x68] sm:$0xff]  ;;  %v79_v3 = vld [vmem:[#allocation5 + $0x60] sm:$0xff]  ;;  %v123_v4 = vld [vmem:[#allocation7 + $0x78] sm:$0xff]  ;;  %s155_s12 = sshll.u32 %s285_s11, 4  ;;  %s156_s12 = int_to_ptr.vmem [resolvable:$true] %s155_s12 }
  0x10   :  { %v78_v5 = vld [vmem:[#allocation5 + $0x58] sm:$0xff]  ;;  %128 = vmatpush.msra.mxu1 %v123_v4  ;;  %v122_v6 = vld [vmem:[#allocation7 + $0x70] sm:$0xff]  ;;  %v121_v7 = vld [vmem:[#allocation7 + $0x68] sm:$0xff] }
  0x11   :  { %88 = vmatpush.msra.mxu0 %v81_v1  ;;  %v77_v8 = vld [vmem:[#allocation5 + $0x50] sm:$0xff]  ;;  %v120_v9 = vld [vmem:[#allocation7 + $0x60] sm:$0xff]  ;;  %v76_v10 = vld [vmem:[#allocation5 + $0x48] sm:$0xff] }
  0x12   :  { %129 = vmatpush.msra.mxu1 %v122_v6  ;;  %v119_v11 = vld [vmem:[#allocation7 + $0x58] sm:$0xff]  ;;  %v75_v12 = vld [vmem:[#allocation5 + $0x40] sm:$0xff]  ;;  %v118_v13 = vld [vmem:[#allocation7 + $0x50] sm:$0xff] }
  0x13   :  { %89 = vmatpush.msra.mxu0 %v80_v2  ;;  %v74_v14 = vld [vmem:[#allocation5 + $0x38] sm:$0xff]  ;;  %v117_v15 = vld [vmem:[#allocation7 + $0x48] sm:$0xff]  ;;  %v73_v16 = vld [vmem:[#allocation5 + $0x30] sm:$0xff] }
  0x14   :  { %130 = vmatpush.msra.mxu1 %v121_v7  ;;  %v116_v17 = vld [vmem:[#allocation7 + $0x40] sm:$0xff]  ;;  %v72_v18 = vld [vmem:[#allocation5 + $0x28] sm:$0xff]  ;;  %v115_v19 = vld [vmem:[#allocation7 + $0x38] sm:$0xff] }
  0x15   :  { %90 = vmatpush.msra.mxu0 %v79_v3  ;;  %v71_v20 = vld [vmem:[#allocation5 + $0x20] sm:$0xff]  ;;  %v114_v21 = vld [vmem:[#allocation7 + $0x30] sm:$0xff]  ;;  %v70_v22 = vld [vmem:[#allocation5 + $0x18] sm:$0xff] }
  0x16   :  { %131 = vmatpush.msra.mxu1 %v120_v9  ;;  %v113_v23 = vld [vmem:[#allocation7 + $0x28] sm:$0xff]  ;;  %v69_v24 = vld [vmem:[#allocation5 + $0x10] sm:$0xff]  ;;  %v112_v25 = vld [vmem:[#allocation7 + $0x20] sm:$0xff] }
  0x17   :  { %91 = vmatpush.msra.mxu0 %v78_v5  ;;  %v68_v26 = vld [vmem:[#allocation5 + $0x8] sm:$0xff]  ;;  %v111_v27 = vld [vmem:[#allocation7 + $0x18] sm:$0xff]  ;;  %v67_v28 = vld [vmem:[#allocation5] sm:$0xff] }
  0x18   :  { %132 = vmatpush.msra.mxu1 %v119_v11  ;;  %v66_v29 = vld [vmem:[#allocation2] sm:$0xff]  ;;  %v110_v30 = vld [vmem:[#allocation7 + $0x10] sm:$0xff]  ;;  %v109_v31 = vld [vmem:[#allocation7 + $0x8] sm:$0xff] }
  0x19   :  { %92 = vmatpush.msra.mxu0 %v77_v8  ;;  %v108_v32 = vld [vmem:[#allocation7] sm:$0xff]  ;;  %v174_v33 = vld [vmem:[%s336_s2] ss:$0 sm:$0xff] }
  0x1a   :  { %133 = vmatpush.msra.mxu1 %v118_v13  ;;  %v175_v37 = vld [vmem:[%s338_s4] ss:$0 sm:$0xff] }
  0x1b   :  { %93 = vmatpush.msra.mxu0 %v76_v10 }
  0x1c   :  { %134 = vmatpush.msra.mxu1 %v117_v15 }
  0x1d   :  { %94 = vmatpush.msra.mxu0 %v75_v12 }
  0x1e   :  { %135 = vmatpush.msra.mxu1 %v116_v17 }
  0x1f   :  { %95 = vmatpush.msra.mxu0 %v74_v14 }
  0x20   :  { %136 = vmatpush.msra.mxu1 %v115_v19 }
  0x21   :  { %96 = vmatpush.msra.mxu0 %v73_v16 }
  0x22   :  { %137 = vmatpush.msra.mxu1 %v114_v21 }
  0x23   :  { %97 = vmatpush.msra.mxu0 %v72_v18 }
  0x24   :  { %138 = vmatpush.msra.mxu1 %v113_v23 }
  0x25   :  { %98 = vmatpush.msra.mxu0 %v71_v20 }
  0x26   :  { %139 = vmatpush.msra.mxu1 %v112_v25 }
  0x27   :  { %99 = vmatpush.msra.mxu0 %v70_v22 }
  0x28   :  { %140 = vmatpush.msra.mxu1 %v111_v27 }
  0x29   :  { %100 = vmatpush.msra.mxu0 %v69_v24 }
  0x2a   :  { %141 = vmatpush.msra.mxu1 %v110_v30 }
  0x2b   :  { %101 = vmatpush.msra.mxu0 %v68_v26 }
  0x2c   :  { %142 = vmatpush.msra.mxu1 %v109_v31 }
  0x2d   :  { %102 = vmatpush.msra.mxu0 %v67_v28 }
  0x2e   :  { %103 = vmatmul.f32.vlgmr.msra.gmra.mxu0 %v66_v29  ;;  %143 = vmatpush.msra.mxu1 %v108_v32 }
  0xab   :  { %v104_v34 = vpop.f32.mrf.mxu0 }
  0xac   :  { %v105_v35 = vadd.f32 %v174_v33, %v104_v34 }
  0xae   :  { %v107_v36 = vmax.f32 %v105_v35, 0.0 }
  0xb0   :  { %144 = vmatmul.f32.vlgmr.msra.gmra.mxu1 %v107_v36 }
 0x12d   :  { %v145_v38 = vpop.f32.mrf.mxu1 }
 0x12e   :  { %v146_v39 = vadd.f32 %v175_v37, %v145_v38 }
 0x130   :  { %176 = vtanh.f32 %v146_v39 }
 0x136   :  { %v177_v40 = vpop.eup %176 }
 0x137   :  { %149 = vst [vmem:[#allocation8] sm:$0xff] %v177_v40 }
 0x138   :  { %160 = dma.vmem_to_hbm [thread:$0]  %s156_s12, 128, %s158_s15, [#allocation4]  }
 0x139   :  { %278 = dma.done.wait [#allocation4], 128  }
 0x13a   :  { %279 = vsyncadd [#allocation4], 4294967168 }
 0x13b   :  { %165 = vsyncpa [#allocation3], 1 }
 0x13c   :  { %166 = vsyncpa [#allocation6], 1 }
 0x13d   :  { %167 = vsyncpa [#allocation4], 1 }

// kernel: tpu_custom_call.1
= control target key start
LH: loop header
LB: loop body
LE: loop exit
PB: predicated region body
PF: predicated region fallthrough
CT: control target
= control target key end

     0   :  { %10 = vsyncpa [#allocation3], 0  ;;  %s334_s0 = inlined_call_operand.hbm [shape: f32[8,128], index: 0, kind: input, shape index: {}]   ;;  %s335_s1 = inlined_call_operand.hbm [shape: f32[128,128], index: 1, kind: input, shape index: {}]   ;;  %s336_s2 = inlined_call_operand.vmem [shape: f32[1,128], index: 2, kind: input, shape index: {}]   ;;  %s337_s3 = inlined_call_operand.hbm [shape: f32[128,128], index: 3, kind: input, shape index: {}]   ;;  %s338_s4 = inlined_call_operand.vmem [shape: f32[1,128], index: 4, kind: input, shape index: {}]   ;;  %s339_s5 = inlined_call_operand.hbm [shape: f32[8,128], index: 5, kind: output, shape index: {}]  }
   0x1   :  { %11 = vsyncpa [#allocation6], 0  ;;  %s28_s20 = sshll.u32 %s335_s1, 4  ;;  %s29_s20 = int_to_ptr.hbm [resolvable:$true] %s28_s20 }
   0x2   :  { %12 = vsyncpa [#allocation4], 0  ;;  %s280_s21 = smov [#allocation5]   ;;  %s18_s25 = sshll.u32 %s334_s0, 4  ;;  %s19_s25 = int_to_ptr.hbm [resolvable:$true] %s18_s25 }
   0x3   :  { %s30_s22 = sshll.u32 %s280_s21, 4  ;;  %s281_s26 = smov 128   ;;  %s31_s22 = int_to_ptr.vmem [resolvable:$true] %s30_s22 }
   0x4   :  { %s282_s27 = smov 8   ;;  %s283_s28 = smov [#allocation2]  }
   0x5   :  { %36 = dma.hbm_to_vmem [thread:$0]  %s29_s20, 2048, %s31_s22, [#allocation6], %s281_s26, %s281_s26, %s282_s27  }
   0x6   :  { %s20_s29 = sshll.u32 %s283_s28, 4  ;;  %s43_s7 = sshll.u32 %s337_s3, 4  ;;  %s21_s29 = int_to_ptr.vmem [resolvable:$true] %s20_s29  ;;  %s44_s7 = int_to_ptr.hbm [resolvable:$true] %s43_s7 }
   0x7   :  { %23 = dma.hbm_to_vmem [thread:$0]  %s19_s25, 128, %s21_s29, [#allocation3]  }
   0x8   :  { %s284_s1 = smov [#allocation7]  }
   0x9   :  { %s45_s8 = sshll.u32 %s284_s1, 4  ;;  %s46_s8 = int_to_ptr.vmem [resolvable:$true] %s45_s8 }
   0xa   :  { %51 = dma.hbm_to_vmem [thread:$0]  %s44_s7, 2048, %s46_s8, [#allocation6], %s281_s26, %s281_s26, %s282_s27  }
   0xb   :  { %274 = dma.done.wait [#allocation3], 128  }
   0xc   :  { %275 = vsyncadd [#allocation3], 4294967168 }
   0xd   :  { %276 = dma.done.wait [#allocation6], 4096  }
   0xe   :  { %277 = vsyncadd [#allocation6], 4294963200  ;;  %v82_v0 = vld [vmem:[#allocation5 + $0x78] sm:$0xff]  ;;  %v81_v1 = vld [vmem:[#allocation5 + $0x70] sm:$0xff]  ;;  %s285_s11 = smov [#allocation8]   ;;  %s157_s15 = sshll.u32 %s339_s5, 4  ;;  %s158_s15 = int_to_ptr.hbm [resolvable:$true] %s157_s15 }
   0xf   :  { %87 = vmatpush.msra.mxu0 %v82_v0  ;;  %v80_v2 = vld [vmem:[#allocation5 + $0x68] sm:$0xff]  ;;  %v79_v3 = vld [vmem:[#allocation5 + $0x60] sm:$0xff]  ;;  %v123_v4 = vld [vmem:[#allocation7 + $0x78] sm:$0xff]  ;;  %s155_s12 = sshll.u32 %s285_s11, 4  ;;  %s156_s12 = int_to_ptr.vmem [resolvable:$true] %s155_s12 }
  0x10   :  { %v78_v5 = vld [vmem:[#allocation5 + $0x58] sm:$0xff]  ;;  %128 = vmatpush.msra.mxu1 %v123_v4  ;;  %v122_v6 = vld [vmem:[#allocation7 + $0x70] sm:$0xff]  ;;  %v121_v7 = vld [vmem:[#allocation7 + $0x68] sm:$0xff] }
  0x11   :  { %88 = vmatpush.msra.mxu0 %v81_v1  ;;  %v77_v8 = vld [vmem:[#allocation5 + $0x50] sm:$0xff]  ;;  %v120_v9 = vld [vmem:[#allocation7 + $0x60] sm:$0xff]  ;;  %v76_v10 = vld [vmem:[#allocation5 + $0x48] sm:$0xff] }
  0x12   :  { %129 = vmatpush.msra.mxu1 %v122_v6  ;;  %v119_v11 = vld [vmem:[#allocation7 + $0x58] sm:$0xff]  ;;  %v75_v12 = vld [vmem:[#allocation5 + $0x40] sm:$0xff]  ;;  %v118_v13 = vld [vmem:[#allocation7 + $0x50] sm:$0xff] }
  0x13   :  { %89 = vmatpush.msra.mxu0 %v80_v2  ;;  %v74_v14 = vld [vmem:[#allocation5 + $0x38] sm:$0xff]  ;;  %v117_v15 = vld [vmem:[#allocation7 + $0x48] sm:$0xff]  ;;  %v73_v16 = vld [vmem:[#allocation5 + $0x30] sm:$0xff] }
  0x14   :  { %130 = vmatpush.msra.mxu1 %v121_v7  ;;  %v116_v17 = vld [vmem:[#allocation7 + $0x40] sm:$0xff]  ;;  %v72_v18 = vld [vmem:[#allocation5 + $0x28] sm:$0xff]  ;;  %v115_v19 = vld [vmem:[#allocation7 + $0x38] sm:$0xff] }
  0x15   :  { %90 = vmatpush.msra.mxu0 %v79_v3  ;;  %v71_v20 = vld [vmem:[#allocation5 + $0x20] sm:$0xff]  ;;  %v114_v21 = vld [vmem:[#allocation7 + $0x30] sm:$0xff]  ;;  %v70_v22 = vld [vmem:[#allocation5 + $0x18] sm:$0xff] }
  0x16   :  { %131 = vmatpush.msra.mxu1 %v120_v9  ;;  %v113_v23 = vld [vmem:[#allocation7 + $0x28] sm:$0xff]  ;;  %v69_v24 = vld [vmem:[#allocation5 + $0x10] sm:$0xff]  ;;  %v112_v25 = vld [vmem:[#allocation7 + $0x20] sm:$0xff] }
  0x17   :  { %91 = vmatpush.msra.mxu0 %v78_v5  ;;  %v68_v26 = vld [vmem:[#allocation5 + $0x8] sm:$0xff]  ;;  %v111_v27 = vld [vmem:[#allocation7 + $0x18] sm:$0xff]  ;;  %v67_v28 = vld [vmem:[#allocation5] sm:$0xff] }
  0x18   :  { %132 = vmatpush.msra.mxu1 %v119_v11  ;;  %v66_v29 = vld [vmem:[#allocation2] sm:$0xff]  ;;  %v110_v30 = vld [vmem:[#allocation7 + $0x10] sm:$0xff]  ;;  %v109_v31 = vld [vmem:[#allocation7 + $0x8] sm:$0xff] }
  0x19   :  { %92 = vmatpush.msra.mxu0 %v77_v8  ;;  %v108_v32 = vld [vmem:[#allocation7] sm:$0xff]  ;;  %v174_v33 = vld [vmem:[%s336_s2] ss:$0 sm:$0xff] }
  0x1a   :  { %133 = vmatpush.msra.mxu1 %v118_v13  ;;  %v175_v37 = vld [vmem:[%s338_s4] ss:$0 sm:$0xff] }
  0x1b   :  { %93 = vmatpush.msra.mxu0 %v76_v10 }
  0x1c   :  { %134 = vmatpush.msra.mxu1 %v117_v15 }
  0x1d   :  { %94 = vmatpush.msra.mxu0 %v75_v12 }
  0x1e   :  { %135 = vmatpush.msra.mxu1 %v116_v17 }
  0x1f   :  { %95 = vmatpush.msra.mxu0 %v74_v14 }
  0x20   :  { %136 = vmatpush.msra.mxu1 %v115_v19 }
  0x21   :  { %96 = vmatpush.msra.mxu0 %v73_v16 }
  0x22   :  { %137 = vmatpush.msra.mxu1 %v114_v21 }
  0x23   :  { %97 = vmatpush.msra.mxu0 %v72_v18 }
  0x24   :  { %138 = vmatpush.msra.mxu1 %v113_v23 }
  0x25   :  { %98 = vmatpush.msra.mxu0 %v71_v20 }
  0x26   :  { %139 = vmatpush.msra.mxu1 %v112_v25 }
  0x27   :  { %99 = vmatpush.msra.mxu0 %v70_v22 }
  0x28   :  { %140 = vmatpush.msra.mxu1 %v111_v27 }
  0x29   :  { %100 = vmatpush.msra.mxu0 %v69_v24 }
  0x2a   :  { %141 = vmatpush.msra.mxu1 %v110_v30 }
  0x2b   :  { %101 = vmatpush.msra.mxu0 %v68_v26 }
  0x2c   :  { %142 = vmatpush.msra.mxu1 %v109_v31 }
  0x2d   :  { %102 = vmatpush.msra.mxu0 %v67_v28 }
  0x2e   :  { %103 = vmatmul.f32.vlgmr.msra.gmra.mxu0 %v66_v29  ;;  %143 = vmatpush.msra.mxu1 %v108_v32 }
  0xab   :  { %v104_v34 = vpop.f32.mrf.mxu0 }
  0xac   :  { %v105_v35 = vadd.f32 %v174_v33, %v104_v34 }
  0xae   :  { %v107_v36 = vmax.f32 %v105_v35, 0.0 }
  0xb0   :  { %144 = vmatmul.f32.vlgmr.msra.gmra.mxu1 %v107_v36 }
 0x12d   :  { %v145_v38 = vpop.f32.mrf.mxu1 }
 0x12e   :  { %v146_v39 = vadd.f32 %v175_v37, %v145_v38 }
 0x130   :  { %176 = vtanh.f32 %v146_v39 }
 0x136   :  { %v177_v40 = vpop.eup %176 }
 0x137   :  { %149 = vst [vmem:[#allocation8] sm:$0xff] %v177_v40 }
 0x138   :  { %160 = dma.vmem_to_hbm [thread:$0]  %s156_s12, 128, %s158_s15, [#allocation4]  }
 0x139   :  { %278 = dma.done.wait [#allocation4], 128  }
 0x13a   :  { %279 = vsyncadd [#allocation4], 4294967168 }
 0x13b   :  { %165 = vsyncpa [#allocation3], 1 }
 0x13c   :  { %166 = vsyncpa [#allocation6], 1 }
 0x13d   :  { %167 = vsyncpa [#allocation4], 1 }

</bundles_post_ra>
